<compile_context>
chip_gen: v5e
topology: v5e:2x2
jax: 0.10.0
libtpu: 0.0.40
codegen_flags: <defaults>
</compile_context>

<pallas_src>
import math
import functools

import jax
import jax.numpy as jnp
import numpy as np
from jax.experimental import pallas as pl
from jax.experimental.pallas import tpu as pltpu


# ---------------------------------------------------------------------------
# Kernel: one (batch, query-tile) grid step.
#   q_ref: (1, TQ, D)   k_ref/v_ref: (1, S, D)   weights: (D, D) / (D, DO)
#   o_ref: (1, TQ, DO)  kproj_ref/vproj_ref: (S, D) VMEM scratch (per-batch cache)
# ---------------------------------------------------------------------------
def _mha_kernel(q_ref, k_ref, v_ref,
                wq_ref, bq_ref, wk_ref, bk_ref, wv_ref, bv_ref,
                wo_ref, bo_ref,
                o_ref,
                kproj_ref, vproj_ref,
                *, num_heads, d_k, scale, compute_dtype, exp_dtype):
    cd = compute_dtype

    # --- once per batch (first query tile): project K and V, cache in VMEM ---
    @pl.when(pl.program_id(1) == 0)
    def _project_kv():
        kproj_ref[...] = (
            jnp.dot(k_ref[0].astype(cd), wk_ref[...].astype(cd),
                    preferred_element_type=jnp.float32) + bk_ref[...]
        ).astype(kproj_ref.dtype)
        vproj_ref[...] = (
            jnp.dot(v_ref[0].astype(cd), wv_ref[...].astype(cd),
                    preferred_element_type=jnp.float32) + bv_ref[...]
        ).astype(vproj_ref.dtype)

    # --- per query tile: Q projection, 1/sqrt(d_k) folded in -----------------
    Q = (jnp.dot(q_ref[0].astype(cd), wq_ref[...].astype(cd),
                 preferred_element_type=jnp.float32) + bq_ref[...]) * scale
    K = kproj_ref[...]                                   # (S, D), compute dtype
    V = vproj_ref[...]                                   # (S, D), compute dtype

    # --- per-head attention ---------------------------------------------------
    # TODO(synk): pack heads block-diagonally (MXU fill when d_k < 128) and
    #             move this loop onto a grid axis / lax.fori_loop to bound the
    #             live ranges of the (TQ, S) temporaries for large num_heads.
    ctx_heads = []
    for h in range(num_heads):
        lo = h * d_k
        Qh = Q[:, lo:lo + d_k].astype(cd)                # (TQ, d_k)
        Kh = K[:, lo:lo + d_k]                           # (S,  d_k)
        Vh = V[:, lo:lo + d_k]                           # (S,  d_k)

        # scores = Qh @ Kh.T (scale already folded into Q), f32 accumulation.
        s = jax.lax.dot_general(
            Qh, Kh, dimension_numbers=(((1,), (1,)), ((), ())),
            preferred_element_type=jnp.float32)          # (TQ, S)

        # Numerically-stable softmax; exp in bf16 on the bf16 path (v6e/v7x
        # EUP rate), sum accumulated in f32, EUP reciprocal for the divide.
        m = jnp.max(s, axis=-1, keepdims=True)
        e = jnp.exp((s - m).astype(exp_dtype))
        denom = jnp.sum(e.astype(jnp.float32), axis=-1, keepdims=True)
        p = (e * pl.reciprocal(denom, approx=True)).astype(cd)

        ctx_heads.append(jnp.dot(p, Vh, preferred_element_type=jnp.float32))

    # In-register concat (no narrow masked stores to a VMEM scratch), then one
    # dense output projection: full-D contraction, lane-dense (>=128) output.
    ctx = jnp.concatenate(ctx_heads, axis=-1).astype(cd)  # (TQ, D)
    out = jnp.dot(ctx, wo_ref[...].astype(cd),
                  preferred_element_type=jnp.float32) + bo_ref[...]
    o_ref[0] = out.astype(o_ref.dtype)


# ---------------------------------------------------------------------------
# Parameter init (mimics nn.Linear shapes; weights stored transposed: (in, out))
# ---------------------------------------------------------------------------
def init_mha_params(key, in_channels, num_heads):
    d_model_in = in_channels
    if d_model_in % num_heads != 0:
        pad = True
        d_model = (d_model_in // num_heads + 1) * num_heads
    else:
        pad = False
        d_model = d_model_in
    d_k = d_model // num_heads
    d_out = d_model_in if pad else d_model

    def linear(k, fan_in, fan_out):
        kw, kb = jax.random.split(k)
        bound = 1.0 / math.sqrt(fan_in)
        w = jax.random.uniform(kw, (fan_in, fan_out), jnp.float32, -bound, bound)
        b = jax.random.uniform(kb, (1, fan_out), jnp.float32, -bound, bound)
        return w, b

    kq, kk, kv, ko = jax.random.split(key, 4)
    return dict(
        wq=linear(kq, d_model, d_model),
        wk=linear(kk, d_model, d_model),
        wv=linear(kv, d_model, d_model),
        wo=linear(ko, d_model, d_out),
        num_heads=num_heads,
        d_model=d_model,
        d_k=d_k,
        pad=pad,
        original_d_model=d_model_in,
    )


# ---------------------------------------------------------------------------
# Helpers
# ---------------------------------------------------------------------------
def _round_up(x, m):
    return ((x + m - 1) // m) * m


def _physical_vmem_bytes():
    """Generation-aware physical VMEM size (64 MiB on v7x, 128 MiB on v5e/v6e)."""
    try:
        return int(pltpu.get_tpu_info().vmem_capacity_bytes)
    except Exception:
        pass
    try:
        if "v7" in jax.devices()[0].device_kind.lower():
            return 64 * 1024 * 1024
    except Exception:
        pass
    return 128 * 1024 * 1024


def _vmem_limit_bytes(S, TQ, D, DO, num_heads, cd_bytes):
    f32 = 4
    # weights/biases (x2 in case single-buffering is not honoured)
    weights = 2 * ((3 * D * D + D * DO) * cd_bytes + (3 * D + DO) * f32)
    # pipelined activation tiles: Q tile + full-seq K/V (x2 buffers) + out tile
    act = 2 * (TQ * D + 2 * S * D) * cd_bytes + 2 * TQ * DO * f32
    # per-batch K/V projection caches
    scratch = 2 * S * D * f32
    # matmul / softmax temporaries
    temps = (num_heads * TQ * S + 4 * TQ * D + 2 * TQ * DO) * f32
    est = weights + act + scratch + temps
    cap = int(0.85 * _physical_vmem_bytes())     # headroom for compiler scratch
    return int(min(max(2 * est, 32 * 1024 * 1024), cap))


def _pick_q_tile(S, target, row_align):
    """Largest query tile <= target that divides S and is a multiple of
    row_align (full sequence if S <= target)."""
    if S <= target:
        return S
    t0 = target - (target % row_align)
    for t in range(t0, row_align - 1, -row_align):
        if S % t == 0:
            return t
    return S


def _grid_invariant_spec(shape):
    """Constant-index_map block (weights / biases): single-buffer it — the
    second pipeline buffer of a grid-invariant input is pure VMEM waste."""
    index_map = lambda b, t: (0,) * len(shape)
    try:
        return pl.BlockSpec(shape, index_map, pipeline_mode=pl.Buffered(1))
    except (TypeError, AttributeError):
        return pl.BlockSpec(shape, index_map)


# ---------------------------------------------------------------------------
# Wrapper
# ---------------------------------------------------------------------------
def mha_forward(params, Q, K, V, *, compute_dtype=jnp.float32, q_tile=512):
    num_heads = params["num_heads"]
    d_model = params["d_model"]
    d_k = params["d_k"]
    wq, bq = params["wq"]
    wk, bk = params["wk"]
    wv, bv = params["wv"]
    wo, bo = params["wo"]

    out_dtype = Q.dtype
    d_out = wo.shape[1]                       # original_d_model when padded

    if params["pad"]:
        pad_len = d_model - params["original_d_model"]
        pad_cfg = [(0, 0), (0, 0), (0, pad_len)]
        Q = jnp.pad(Q, pad_cfg)
        K = jnp.pad(K, pad_cfg)
        V = jnp.pad(V, pad_cfg)

    # Lane-dense output: zero-pad W_o / b_o columns up to a multiple of 128 so
    # the kernel only issues unmasked stores; slice back in the wrapper.
    DO = max(_round_up(d_out, 128), 128)
    if DO != d_out:
        wo = jnp.pad(wo, ((0, 0), (0, DO - d_out)))
        bo = jnp.pad(bo, ((0, 0), (0, DO - d_out)))

    # bf16 path: ship activations + weights in the compute dtype (halves HBM
    # DMA and weight VMEM); biases stay f32 and all matmuls accumulate in f32.
    if compute_dtype != jnp.float32:
        Q = Q.astype(compute_dtype)
        K = K.astype(compute_dtype)
        V = V.astype(compute_dtype)
        wq = wq.astype(compute_dtype)
        wk = wk.astype(compute_dtype)
        wv = wv.astype(compute_dtype)
        wo = wo.astype(compute_dtype)

    B, S, D = Q.shape
    assert D == d_model

    row_align = 16 if compute_dtype == jnp.bfloat16 else 8
    TQ = _pick_q_tile(S, q_tile, row_align)
    n_q = S // TQ

    cd_bytes = jnp.dtype(compute_dtype).itemsize
    exp_dtype = jnp.bfloat16 if compute_dtype == jnp.bfloat16 else jnp.float32

    kernel = functools.partial(
        _mha_kernel,
        num_heads=num_heads,
        d_k=d_k,
        scale=1.0 / math.sqrt(d_k),
        compute_dtype=compute_dtype,
        exp_dtype=exp_dtype,
    )

    out = pl.pallas_call(
        kernel,
        out_shape=jax.ShapeDtypeStruct((B, S, DO), out_dtype),
        grid=(B, n_q),
        in_specs=[
            pl.BlockSpec((1, TQ, D), lambda b, t: (b, t, 0)),   # Q  (query tiled)
            pl.BlockSpec((1, S, D), lambda b, t: (b, 0, 0)),    # K  (batch only)
            pl.BlockSpec((1, S, D), lambda b, t: (b, 0, 0)),    # V  (batch only)
            _grid_invariant_spec((D, D)),      # W_q
            _grid_invariant_spec((1, D)),      # b_q
            _grid_invariant_spec((D, D)),      # W_k
            _grid_invariant_spec((1, D)),      # b_k
            _grid_invariant_spec((D, D)),      # W_v
            _grid_invariant_spec((1, D)),      # b_v
            _grid_invariant_spec((D, DO)),     # W_o (lane-padded columns)
            _grid_invariant_spec((1, DO)),     # b_o
        ],
        out_specs=pl.BlockSpec((1, TQ, DO), lambda b, t: (b, t, 0)),
        scratch_shapes=[
            pltpu.VMEM((S, D), compute_dtype),   # cached K projection (per batch)
            pltpu.VMEM((S, D), compute_dtype),   # cached V projection (per batch)
        ],
        compiler_params=pltpu.CompilerParams(
            # batch axis parallel (megacore); query-tile axis arbitrary so the
            # per-batch K/V projection cache carried in scratch stays valid.
            dimension_semantics=("parallel", "arbitrary"),
            vmem_limit_bytes=_vmem_limit_bytes(S, TQ, D, DO, num_heads, cd_bytes),
        ),
    )(Q, K, V, wq, bq, wk, bk, wv, bv, wo, bo)

    if DO != d_out:
        out = out[:, :, :d_out]
    # PyTorch module returns (output, output)
    return out, out


# ---------------------------------------------------------------------------
# Pure-JAX reference (exact softmax, f32) for correctness checks
# ---------------------------------------------------------------------------
def mha_reference(params, Q, K, V):
    H, d_k, D = params["num_heads"], params["d_k"], params["d_model"]
    wq, bq = params["wq"]; wk, bk = params["wk"]
    wv, bv = params["wv"]; wo, bo = params["wo"]
    if params["pad"]:
        pad_len = D - params["original_d_model"]
        pad_cfg = [(0, 0), (0, 0), (0, pad_len)]
        Q = jnp.pad(Q, pad_cfg); K = jnp.pad(K, pad_cfg); V = jnp.pad(V, pad_cfg)
    B, S, _ = Q.shape

    def split(x):
        return x.reshape(B, S, H, d_k).transpose(0, 2, 1, 3)

    Qh = split(Q @ wq + bq)
    Kh = split(K @ wk + bk)
    Vh = split(V @ wv + bv)
    scores = jnp.einsum('bhqd,bhkd->bhqk', Qh, Kh) / math.sqrt(d_k)
    probs = jax.nn.softmax(scores, axis=-1)
    ctx = jnp.einsum('bhqk,bhkd->bhqd', probs, Vh)
    combined = ctx.transpose(0, 2, 1, 3).reshape(B, S, D)
    return combined @ wo + bo     # (B, S, original_d_model) when padded


# ---------------------------------------------------------------------------
if __name__ == "__main__":
    key = jax.random.PRNGKey(0)

    batch, seq = 2, 8
    # (in_channels, num_heads): second config exercises the d_model-padding path
    configs = [(32, 4), (30, 4)]

    for idx, (in_channels, num_heads) in enumerate(configs):
        key, k_param, k_q, k_k, k_v = jax.random.split(key, 5)
        params = init_mha_params(k_param, in_channels, num_heads)

        Q = jax.random.normal(k_q, (batch, seq, in_channels), jnp.float32)
        K = jax.random.normal(k_k, (batch, seq, in_channels), jnp.float32)
        V = jax.random.normal(k_v, (batch, seq, in_channels), jnp.float32)

        ref = mha_reference(params, Q, K, V)

        # f32 compute path (tight tolerance; approx reciprocal in the softmax)
        out, out_dup = mha_forward(params, Q, K, V)
        out = jax.block_until_ready(out)
        np.testing.assert_allclose(np.asarray(out), np.asarray(ref),
                                   rtol=5e-3, atol=5e-3)

        # bf16 path (bf16 DMA/MXU/EUP, f32 accumulation); looser tolerance
        if idx == 0:
            out_bf16, _ = mha_forward(params, Q, K, V,
                                      compute_dtype=jnp.bfloat16)
            out_bf16 = jax.block_until_ready(out_bf16)
            np.testing.assert_allclose(np.asarray(out_bf16), np.asarray(ref),
                                       rtol=1e-1, atol=1e-1)

    print("KERNEL_OK")
</pallas_src>

<mosaic_0001>
module attributes {stable_mosaic.version = 11 : i64} {
  func.func @_mha_kernel(%arg0: i32, %arg1: i32, %arg2: memref<1x8x32xf32, #tpu.memory_space<vmem>>, %arg3: memref<1x8x32xf32, #tpu.memory_space<vmem>>, %arg4: memref<1x8x32xf32, #tpu.memory_space<vmem>>, %arg5: memref<32x32xf32, #tpu.memory_space<vmem>>, %arg6: memref<1x32xf32, #tpu.memory_space<vmem>>, %arg7: memref<32x32xf32, #tpu.memory_space<vmem>>, %arg8: memref<1x32xf32, #tpu.memory_space<vmem>>, %arg9: memref<32x32xf32, #tpu.memory_space<vmem>>, %arg10: memref<1x32xf32, #tpu.memory_space<vmem>>, %arg11: memref<32x128xf32, #tpu.memory_space<vmem>>, %arg12: memref<1x128xf32, #tpu.memory_space<vmem>>, %arg13: memref<1x8x128xf32, #tpu.memory_space<vmem>>, %arg14: memref<8x32xf32, #tpu.memory_space<vmem>>, %arg15: memref<8x32xf32, #tpu.memory_space<vmem>>) attributes {dimension_semantics = [#tpu.dimension_semantics<parallel>, #tpu.dimension_semantics<arbitrary>], iteration_bounds = array<i64: 2, 1>, scalar_prefetch = 0 : i64, scratch_operands = 2 : i64, tpu.core_type = #tpu.core_type<tc>, window_params = [{transform_indices = @transform_0, window_bounds = array<i64: 1, 8, 32>}, {transform_indices = @transform_1, window_bounds = array<i64: 1, 8, 32>}, {transform_indices = @transform_2, window_bounds = array<i64: 1, 8, 32>}, {pipeline_mode = #tpu.pipeline_mode<synchronous>, transform_indices = @transform_3, window_bounds = array<i64: 32, 32>}, {pipeline_mode = #tpu.pipeline_mode<synchronous>, transform_indices = @transform_4, window_bounds = array<i64: 1, 32>}, {pipeline_mode = #tpu.pipeline_mode<synchronous>, transform_indices = @transform_5, window_bounds = array<i64: 32, 32>}, {pipeline_mode = #tpu.pipeline_mode<synchronous>, transform_indices = @transform_6, window_bounds = array<i64: 1, 32>}, {pipeline_mode = #tpu.pipeline_mode<synchronous>, transform_indices = @transform_7, window_bounds = array<i64: 32, 32>}, {pipeline_mode = #tpu.pipeline_mode<synchronous>, transform_indices = @transform_8, window_bounds = array<i64: 1, 32>}, {pipeline_mode = #tpu.pipeline_mode<synchronous>, transform_indices = @transform_9, window_bounds = array<i64: 32, 128>}, {pipeline_mode = #tpu.pipeline_mode<synchronous>, transform_indices = @transform_10, window_bounds = array<i64: 1, 128>}, {transform_indices = @transform_11, window_bounds = array<i64: 1, 8, 128>}]} {
    %c0_i32 = arith.constant 0 : i32
    %0 = arith.cmpi eq, %arg1, %c0_i32 : i32
    %1 = arith.extui %0 : i1 to i32
    %c0_i32_0 = arith.constant 0 : i32
    %2 = arith.cmpi ne, %1, %c0_i32_0 : i32
    scf.if %2 {
      %c0_36 = arith.constant 0 : index
      %c0_37 = arith.constant 0 : index
      %c0_38 = arith.constant 0 : index
      %83 = vector.load %arg3[%c0_36, %c0_37, %c0_38] : memref<1x8x32xf32, #tpu.memory_space<vmem>>, vector<1x8x32xf32>
      %84 = vector.shape_cast %83 : vector<1x8x32xf32> to vector<8x32xf32>
      %c0_39 = arith.constant 0 : index
      %c0_40 = arith.constant 0 : index
      %85 = vector.load %arg7[%c0_39, %c0_40] : memref<32x32xf32, #tpu.memory_space<vmem>>, vector<32x32xf32>
      %cst_41 = arith.constant dense<0.000000e+00> : vector<8x32xf32>
      %86 = tpu.matmul %84, %85, %cst_41 {dimension_numbers = #tpu.dot_dimension_numbers<[1], [0], [0], [1], [0, 0, 1, 1], [], []>} : vector<8x32xf32>, vector<32x32xf32>, vector<8x32xf32> -> vector<8x32xf32>
      %c0_42 = arith.constant 0 : index
      %c0_43 = arith.constant 0 : index
      %87 = vector.load %arg8[%c0_42, %c0_43] : memref<1x32xf32, #tpu.memory_space<vmem>>, vector<1x32xf32>
      %88 = vector.broadcast %87 : vector<1x32xf32> to vector<8x32xf32>
      %89 = arith.addf %86, %88 : vector<8x32xf32>
      %c0_44 = arith.constant 0 : index
      %c0_45 = arith.constant 0 : index
      %90 = vector.load %arg14[%c0_44, %c0_45] : memref<8x32xf32, #tpu.memory_space<vmem>>, vector<8x32xf32>
      tpu.vector_store %arg14[%c0_44, %c0_45], %89 {strides = array<i32>} : memref<8x32xf32, #tpu.memory_space<vmem>>, vector<8x32xf32>,
      %c0_46 = arith.constant 0 : index
      %c0_47 = arith.constant 0 : index
      %c0_48 = arith.constant 0 : index
      %91 = vector.load %arg4[%c0_46, %c0_47, %c0_48] : memref<1x8x32xf32, #tpu.memory_space<vmem>>, vector<1x8x32xf32>
      %92 = vector.shape_cast %91 : vector<1x8x32xf32> to vector<8x32xf32>
      %c0_49 = arith.constant 0 : index
      %c0_50 = arith.constant 0 : index
      %93 = vector.load %arg9[%c0_49, %c0_50] : memref<32x32xf32, #tpu.memory_space<vmem>>, vector<32x32xf32>
      %cst_51 = arith.constant dense<0.000000e+00> : vector<8x32xf32>
      %94 = tpu.matmul %92, %93, %cst_51 {dimension_numbers = #tpu.dot_dimension_numbers<[1], [0], [0], [1], [0, 0, 1, 1], [], []>} : vector<8x32xf32>, vector<32x32xf32>, vector<8x32xf32> -> vector<8x32xf32>
      %c0_52 = arith.constant 0 : index
      %c0_53 = arith.constant 0 : index
      %95 = vector.load %arg10[%c0_52, %c0_53] : memref<1x32xf32, #tpu.memory_space<vmem>>, vector<1x32xf32>
      %96 = vector.broadcast %95 : vector<1x32xf32> to vector<8x32xf32>
      %97 = arith.addf %94, %96 : vector<8x32xf32>
      %c0_54 = arith.constant 0 : index
      %c0_55 = arith.constant 0 : index
      %98 = vector.load %arg15[%c0_54, %c0_55] : memref<8x32xf32, #tpu.memory_space<vmem>>, vector<8x32xf32>
      tpu.vector_store %arg15[%c0_54, %c0_55], %97 {strides = array<i32>} : memref<8x32xf32, #tpu.memory_space<vmem>>, vector<8x32xf32>,
    } else {
    }
    %c0 = arith.constant 0 : index
    %c0_1 = arith.constant 0 : index
    %c0_2 = arith.constant 0 : index
    %3 = vector.load %arg2[%c0, %c0_1, %c0_2] : memref<1x8x32xf32, #tpu.memory_space<vmem>>, vector<1x8x32xf32>
    %4 = vector.shape_cast %3 : vector<1x8x32xf32> to vector<8x32xf32>
    %c0_3 = arith.constant 0 : index
    %c0_4 = arith.constant 0 : index
    %5 = vector.load %arg5[%c0_3, %c0_4] : memref<32x32xf32, #tpu.memory_space<vmem>>, vector<32x32xf32>
    %cst = arith.constant dense<0.000000e+00> : vector<8x32xf32>
    %6 = tpu.matmul %4, %5, %cst {dimension_numbers = #tpu.dot_dimension_numbers<[1], [0], [0], [1], [0, 0, 1, 1], [], []>} : vector<8x32xf32>, vector<32x32xf32>, vector<8x32xf32> -> vector<8x32xf32>
    %c0_5 = arith.constant 0 : index
    %c0_6 = arith.constant 0 : index
    %7 = vector.load %arg6[%c0_5, %c0_6] : memref<1x32xf32, #tpu.memory_space<vmem>>, vector<1x32xf32>
    %8 = vector.broadcast %7 : vector<1x32xf32> to vector<8x32xf32>
    %9 = arith.addf %6, %8 : vector<8x32xf32>
    %cst_7 = arith.constant 0.353553385 : f32
    %10 = vector.broadcast %cst_7 : f32 to vector<8x32xf32>
    %11 = arith.mulf %9, %10 : vector<8x32xf32>
    %c0_8 = arith.constant 0 : index
    %c0_9 = arith.constant 0 : index
    %12 = vector.load %arg14[%c0_8, %c0_9] : memref<8x32xf32, #tpu.memory_space<vmem>>, vector<8x32xf32>
    %c0_10 = arith.constant 0 : index
    %c0_11 = arith.constant 0 : index
    %13 = vector.load %arg15[%c0_10, %c0_11] : memref<8x32xf32, #tpu.memory_space<vmem>>, vector<8x32xf32>
    %14 = vector.extract_strided_slice %11 {offsets = [0, 0], sizes = [8, 8], strides = [1, 1]} : vector<8x32xf32> to vector<8x8xf32>
    %15 = vector.extract_strided_slice %12 {offsets = [0, 0], sizes = [8, 8], strides = [1, 1]} : vector<8x32xf32> to vector<8x8xf32>
    %16 = vector.extract_strided_slice %13 {offsets = [0, 0], sizes = [8, 8], strides = [1, 1]} : vector<8x32xf32> to vector<8x8xf32>
    %cst_12 = arith.constant dense<0.000000e+00> : vector<8x8xf32>
    %17 = tpu.matmul %14, %15, %cst_12 {dimension_numbers = #tpu.dot_dimension_numbers<[1], [1], [0], [0], [0, 0, 1, 0], [], []>} : vector<8x8xf32>, vector<8x8xf32>, vector<8x8xf32> -> vector<8x8xf32>
    %cst_13 = arith.constant dense<0xFF800000> : vector<8xf32>
    %18 = vector.multi_reduction <maximumf>, %17, %cst_13 [1] : vector<8x8xf32> to vector<8xf32>
    %19 = vector.shape_cast %18 : vector<8xf32> to vector<8x1xf32>
    %20 = vector.broadcast %19 : vector<8x1xf32> to vector<8x8xf32>
    %21 = arith.subf %17, %20 : vector<8x8xf32>
    %22 = math.exp %21 : vector<8x8xf32>
    %cst_14 = arith.constant dense<0.000000e+00> : vector<8xf32>
    %23 = vector.multi_reduction <add>, %22, %cst_14 [1] : vector<8x8xf32> to vector<8xf32>
    %24 = vector.shape_cast %23 : vector<8xf32> to vector<8x1xf32>
    %25 = tpu.reciprocal %24 {approx = true} : vector<8x1xf32> -> vector<8x1xf32>
    %26 = vector.broadcast %25 : vector<8x1xf32> to vector<8x8xf32>
    %27 = arith.mulf %22, %26 : vector<8x8xf32>
    %cst_15 = arith.constant dense<0.000000e+00> : vector<8x8xf32>
    %28 = tpu.matmul %27, %16, %cst_15 {dimension_numbers = #tpu.dot_dimension_numbers<[1], [0], [0], [1], [0, 0, 1, 1], [], []>} : vector<8x8xf32>, vector<8x8xf32>, vector<8x8xf32> -> vector<8x8xf32>
    %29 = vector.extract_strided_slice %11 {offsets = [0, 8], sizes = [8, 8], strides = [1, 1]} : vector<8x32xf32> to vector<8x8xf32>
    %30 = vector.extract_strided_slice %12 {offsets = [0, 8], sizes = [8, 8], strides = [1, 1]} : vector<8x32xf32> to vector<8x8xf32>
    %31 = vector.extract_strided_slice %13 {offsets = [0, 8], sizes = [8, 8], strides = [1, 1]} : vector<8x32xf32> to vector<8x8xf32>
    %cst_16 = arith.constant dense<0.000000e+00> : vector<8x8xf32>
    %32 = tpu.matmul %29, %30, %cst_16 {dimension_numbers = #tpu.dot_dimension_numbers<[1], [1], [0], [0], [0, 0, 1, 0], [], []>} : vector<8x8xf32>, vector<8x8xf32>, vector<8x8xf32> -> vector<8x8xf32>
    %cst_17 = arith.constant dense<0xFF800000> : vector<8xf32>
    %33 = vector.multi_reduction <maximumf>, %32, %cst_17 [1] : vector<8x8xf32> to vector<8xf32>
    %34 = vector.shape_cast %33 : vector<8xf32> to vector<8x1xf32>
    %35 = vector.broadcast %34 : vector<8x1xf32> to vector<8x8xf32>
    %36 = arith.subf %32, %35 : vector<8x8xf32>
    %37 = math.exp %36 : vector<8x8xf32>
    %cst_18 = arith.constant dense<0.000000e+00> : vector<8xf32>
    %38 = vector.multi_reduction <add>, %37, %cst_18 [1] : vector<8x8xf32> to vector<8xf32>
    %39 = vector.shape_cast %38 : vector<8xf32> to vector<8x1xf32>
    %40 = tpu.reciprocal %39 {approx = true} : vector<8x1xf32> -> vector<8x1xf32>
    %41 = vector.broadcast %40 : vector<8x1xf32> to vector<8x8xf32>
    %42 = arith.mulf %37, %41 : vector<8x8xf32>
    %cst_19 = arith.constant dense<0.000000e+00> : vector<8x8xf32>
    %43 = tpu.matmul %42, %31, %cst_19 {dimension_numbers = #tpu.dot_dimension_numbers<[1], [0], [0], [1], [0, 0, 1, 1], [], []>} : vector<8x8xf32>, vector<8x8xf32>, vector<8x8xf32> -> vector<8x8xf32>
    %44 = vector.extract_strided_slice %11 {offsets = [0, 16], sizes = [8, 8], strides = [1, 1]} : vector<8x32xf32> to vector<8x8xf32>
    %45 = vector.extract_strided_slice %12 {offsets = [0, 16], sizes = [8, 8], strides = [1, 1]} : vector<8x32xf32> to vector<8x8xf32>
    %46 = vector.extract_strided_slice %13 {offsets = [0, 16], sizes = [8, 8], strides = [1, 1]} : vector<8x32xf32> to vector<8x8xf32>
    %cst_20 = arith.constant dense<0.000000e+00> : vector<8x8xf32>
    %47 = tpu.matmul %44, %45, %cst_20 {dimension_numbers = #tpu.dot_dimension_numbers<[1], [1], [0], [0], [0, 0, 1, 0], [], []>} : vector<8x8xf32>, vector<8x8xf32>, vector<8x8xf32> -> vector<8x8xf32>
    %cst_21 = arith.constant dense<0xFF800000> : vector<8xf32>
    %48 = vector.multi_reduction <maximumf>, %47, %cst_21 [1] : vector<8x8xf32> to vector<8xf32>
    %49 = vector.shape_cast %48 : vector<8xf32> to vector<8x1xf32>
    %50 = vector.broadcast %49 : vector<8x1xf32> to vector<8x8xf32>
    %51 = arith.subf %47, %50 : vector<8x8xf32>
    %52 = math.exp %51 : vector<8x8xf32>
    %cst_22 = arith.constant dense<0.000000e+00> : vector<8xf32>
    %53 = vector.multi_reduction <add>, %52, %cst_22 [1] : vector<8x8xf32> to vector<8xf32>
    %54 = vector.shape_cast %53 : vector<8xf32> to vector<8x1xf32>
    %55 = tpu.reciprocal %54 {approx = true} : vector<8x1xf32> -> vector<8x1xf32>
    %56 = vector.broadcast %55 : vector<8x1xf32> to vector<8x8xf32>
    %57 = arith.mulf %52, %56 : vector<8x8xf32>
    %cst_23 = arith.constant dense<0.000000e+00> : vector<8x8xf32>
    %58 = tpu.matmul %57, %46, %cst_23 {dimension_numbers = #tpu.dot_dimension_numbers<[1], [0], [0], [1], [0, 0, 1, 1], [], []>} : vector<8x8xf32>, vector<8x8xf32>, vector<8x8xf32> -> vector<8x8xf32>
    %59 = vector.extract_strided_slice %11 {offsets = [0, 24], sizes = [8, 8], strides = [1, 1]} : vector<8x32xf32> to vector<8x8xf32>
    %60 = vector.extract_strided_slice %12 {offsets = [0, 24], sizes = [8, 8], strides = [1, 1]} : vector<8x32xf32> to vector<8x8xf32>
    %61 = vector.extract_strided_slice %13 {offsets = [0, 24], sizes = [8, 8], strides = [1, 1]} : vector<8x32xf32> to vector<8x8xf32>
    %cst_24 = arith.constant dense<0.000000e+00> : vector<8x8xf32>
    %62 = tpu.matmul %59, %60, %cst_24 {dimension_numbers = #tpu.dot_dimension_numbers<[1], [1], [0], [0], [0, 0, 1, 0], [], []>} : vector<8x8xf32>, vector<8x8xf32>, vector<8x8xf32> -> vector<8x8xf32>
    %cst_25 = arith.constant dense<0xFF800000> : vector<8xf32>
    %63 = vector.multi_reduction <maximumf>, %62, %cst_25 [1] : vector<8x8xf32> to vector<8xf32>
    %64 = vector.shape_cast %63 : vector<8xf32> to vector<8x1xf32>
    %65 = vector.broadcast %64 : vector<8x1xf32> to vector<8x8xf32>
    %66 = arith.subf %62, %65 : vector<8x8xf32>
    %67 = math.exp %66 : vector<8x8xf32>
    %cst_26 = arith.constant dense<0.000000e+00> : vector<8xf32>
    %68 = vector.multi_reduction <add>, %67, %cst_26 [1] : vector<8x8xf32> to vector<8xf32>
    %69 = vector.shape_cast %68 : vector<8xf32> to vector<8x1xf32>
    %70 = tpu.reciprocal %69 {approx = true} : vector<8x1xf32> -> vector<8x1xf32>
    %71 = vector.broadcast %70 : vector<8x1xf32> to vector<8x8xf32>
    %72 = arith.mulf %67, %71 : vector<8x8xf32>
    %cst_27 = arith.constant dense<0.000000e+00> : vector<8x8xf32>
    %73 = tpu.matmul %72, %61, %cst_27 {dimension_numbers = #tpu.dot_dimension_numbers<[1], [0], [0], [1], [0, 0, 1, 1], [], []>} : vector<8x8xf32>, vector<8x8xf32>, vector<8x8xf32> -> vector<8x8xf32>
    %74 = tpu.concatenate %28, %43, %58, %73 in 1 : vector<8x8xf32>, vector<8x8xf32>, vector<8x8xf32>, vector<8x8xf32> -> vector<8x32xf32>
    %c0_28 = arith.constant 0 : index
    %c0_29 = arith.constant 0 : index
    %75 = vector.load %arg11[%c0_28, %c0_29] : memref<32x128xf32, #tpu.memory_space<vmem>>, vector<32x128xf32>
    %cst_30 = arith.constant dense<0.000000e+00> : vector<8x128xf32>
    %76 = tpu.matmul %74, %75, %cst_30 {dimension_numbers = #tpu.dot_dimension_numbers<[1], [0], [0], [1], [0, 0, 1, 1], [], []>} : vector<8x32xf32>, vector<32x128xf32>, vector<8x128xf32> -> vector<8x128xf32>
    %c0_31 = arith.constant 0 : index
    %c0_32 = arith.constant 0 : index
    %77 = vector.load %arg12[%c0_31, %c0_32] : memref<1x128xf32, #tpu.memory_space<vmem>>, vector<1x128xf32>
    %78 = vector.broadcast %77 : vector<1x128xf32> to vector<8x128xf32>
    %79 = arith.addf %76, %78 : vector<8x128xf32>
    %c0_33 = arith.constant 0 : index
    %c0_34 = arith.constant 0 : index
    %c0_35 = arith.constant 0 : index
    %80 = vector.load %arg13[%c0_33, %c0_34, %c0_35] : memref<1x8x128xf32, #tpu.memory_space<vmem>>, vector<1x8x128xf32>
    %81 = vector.shape_cast %80 : vector<1x8x128xf32> to vector<8x128xf32>
    %82 = vector.shape_cast %79 : vector<8x128xf32> to vector<1x8x128xf32>
    tpu.vector_store %arg13[%c0_33, %c0_34, %c0_35], %82 {strides = array<i32>} : memref<1x8x128xf32, #tpu.memory_space<vmem>>, vector<1x8x128xf32>,
    return
  }
  func.func @transform_0(%arg0: i32, %arg1: i32) -> (i32, i32, i32) {
    %c0_i32 = arith.constant 0 : i32
    %c0_i32_0 = arith.constant 0 : i32
    return %arg0, %arg1, %c0_i32 : i32, i32, i32
  }
  func.func @transform_1(%arg0: i32, %arg1: i32) -> (i32, i32, i32) {
    %c0_i32 = arith.constant 0 : i32
    %c0_i32_0 = arith.constant 0 : i32
    %c0_i32_1 = arith.constant 0 : i32
    return %arg0, %c0_i32, %c0_i32_0 : i32, i32, i32
  }
  func.func @transform_2(%arg0: i32, %arg1: i32) -> (i32, i32, i32) {
    %c0_i32 = arith.constant 0 : i32
    %c0_i32_0 = arith.constant 0 : i32
    %c0_i32_1 = arith.constant 0 : i32
    return %arg0, %c0_i32, %c0_i32_0 : i32, i32, i32
  }
  func.func @transform_3(%arg0: i32, %arg1: i32) -> (i32, i32) {
    %c0_i32 = arith.constant 0 : i32
    %c0_i32_0 = arith.constant 0 : i32
    %c0_i32_1 = arith.constant 0 : i32
    return %c0_i32, %c0_i32_0 : i32, i32
  }
  func.func @transform_4(%arg0: i32, %arg1: i32) -> (i32, i32) {
    %c0_i32 = arith.constant 0 : i32
    %c0_i32_0 = arith.constant 0 : i32
    %c0_i32_1 = arith.constant 0 : i32
    return %c0_i32, %c0_i32_0 : i32, i32
  }
  func.func @transform_5(%arg0: i32, %arg1: i32) -> (i32, i32) {
    %c0_i32 = arith.constant 0 : i32
    %c0_i32_0 = arith.constant 0 : i32
    %c0_i32_1 = arith.constant 0 : i32
    return %c0_i32, %c0_i32_0 : i32, i32
  }
  func.func @transform_6(%arg0: i32, %arg1: i32) -> (i32, i32) {
    %c0_i32 = arith.constant 0 : i32
    %c0_i32_0 = arith.constant 0 : i32
    %c0_i32_1 = arith.constant 0 : i32
    return %c0_i32, %c0_i32_0 : i32, i32
  }
  func.func @transform_7(%arg0: i32, %arg1: i32) -> (i32, i32) {
    %c0_i32 = arith.constant 0 : i32
    %c0_i32_0 = arith.constant 0 : i32
    %c0_i32_1 = arith.constant 0 : i32
    return %c0_i32, %c0_i32_0 : i32, i32
  }
  func.func @transform_8(%arg0: i32, %arg1: i32) -> (i32, i32) {
    %c0_i32 = arith.constant 0 : i32
    %c0_i32_0 = arith.constant 0 : i32
    %c0_i32_1 = arith.constant 0 : i32
    return %c0_i32, %c0_i32_0 : i32, i32
  }
  func.func @transform_9(%arg0: i32, %arg1: i32) -> (i32, i32) {
    %c0_i32 = arith.constant 0 : i32
    %c0_i32_0 = arith.constant 0 : i32
    %c0_i32_1 = arith.constant 0 : i32
    return %c0_i32, %c0_i32_0 : i32, i32
  }
  func.func @transform_10(%arg0: i32, %arg1: i32) -> (i32, i32) {
    %c0_i32 = arith.constant 0 : i32
    %c0_i32_0 = arith.constant 0 : i32
    %c0_i32_1 = arith.constant 0 : i32
    return %c0_i32, %c0_i32_0 : i32, i32
  }
  func.func @transform_11(%arg0: i32, %arg1: i32) -> (i32, i32, i32) {
    %c0_i32 = arith.constant 0 : i32
    %c0_i32_0 = arith.constant 0 : i32
    return %arg0, %arg1, %c0_i32 : i32, i32, i32
  }
}

</mosaic_0001>

<bundles_post_ra>
// kernel: tpu_custom_call.1
= control target key start
LH: loop header
LB: loop body
LE: loop exit
PB: predicated region body
PF: predicated region fallthrough
CT: control target
= control target key end

     0   :  { %s1987_s0 = inlined_call_operand.hbm [shape: f32[2,8,32], index: 0, kind: input, shape index: {}]   ;;  %s1988_s1 = inlined_call_operand.hbm [shape: f32[2,8,32], index: 1, kind: input, shape index: {}]   ;;  %s1989_s2 = inlined_call_operand.hbm [shape: f32[2,8,32], index: 2, kind: input, shape index: {}]   ;;  %s1990_s3 = inlined_call_operand.hbm [shape: f32[32,32], index: 3, kind: input, shape index: {}]   ;;  %s1991_s4 = inlined_call_operand.vmem [shape: f32[1,32], index: 4, kind: input, shape index: {}]   ;;  %s1992_s5 = inlined_call_operand.hbm [shape: f32[32,32], index: 5, kind: input, shape index: {}]   ;;  %s1993_s6 = inlined_call_operand.vmem [shape: f32[1,32], index: 6, kind: input, shape index: {}]   ;;  %s1994_s7 = inlined_call_operand.hbm [shape: f32[32,32], index: 7, kind: input, shape index: {}]   ;;  %s1995_s8 = inlined_call_operand.vmem [shape: f32[1,32], index: 8, kind: input, shape index: {}]   ;;  %s1996_s9 = inlined_call_operand.hbm [shape: f32[32,128], index: 9, kind: input, shape index: {}]   ;;  %s1997_s10 = inlined_call_operand.vmem [shape: f32[1,128], index: 10, kind: input, shape index: {}]   ;;  %s1998_s11 = inlined_call_operand.hbm [shape: f32[2,8,128], index: 11, kind: output, shape index: {}]  }
   0x1   :  { %2012 = sst [smem:[#allocation29_spill]] %s1987_s0 }
   0x2   :  { %2013 = sst [smem:[#allocation30_spill]] %s1988_s1 }
   0x3   :  { %2014 = sst [smem:[#allocation31_spill]] %s1990_s3 }
   0x4   :  { %2015 = sst [smem:[#allocation32_spill]] %s1992_s5 }
   0x5   :  { %2016 = sst [smem:[#allocation33_spill]] %s1994_s7 }
   0x6   :  { %2017 = sst [smem:[#allocation34_spill]] %s1996_s9 }
   0x7   :  { %2018 = sst [smem:[#allocation35_spill]] %s1997_s10 }
   0x8   :  { %16 = vsyncpa [#allocation5], 0 }
   0x9   :  { %18 = vsyncpa [#allocation5 + $0x1], 0 }
   0xa   :  { %19 = vsyncpa [#allocation8], 0 }
   0xb   :  { %21 = vsyncpa [#allocation8 + $0x1], 0 }
   0xc   :  { %22 = vsyncpa [#allocation11], 0 }
   0xd   :  { %23 = vsyncpa [#allocation14], 0 }
   0xe   :  { %24 = vsyncpa [#allocation6], 0 }
   0xf   :  { %26 = vsyncpa [#allocation6 + $0x1], 0  ;;  %s1715_s17 = smov 0   ;;  %s1717_s18 = smov 0  }
  0x10   :  { %s1719_s19 = smov 0   ;;  %s1721_s20 = smov 0  }
  0x11   :  { %s1723_s21 = smov 0   ;;  %s1725_s22 = smov 0  }
  0x12 LB: > { %2019 = sst [smem:[#allocation22_spill]] %s1621_s17  ;;  %s1746_s23 = sadd.s32 4294967295, %s1641_s22   ;;  %s1641_s22 = sphi %s1725_s22, %s32_s22   ;;  %s1637_s21 = sphi %s1723_s21, %s2053_s21   ;;  %s1633_s20 = sphi %s1721_s20, %s2048_s20   ;;  %s1629_s19 = sphi %s1719_s19, %s2052_s19   ;;  %s1625_s18 = sphi %s1717_s18, %s2051_s18   ;;  %s1621_s17 = sphi %s1715_s17, %s2050_s17  }
  0x13   : > { %2020 = sst [smem:[#allocation23_spill]] %s1637_s21  ;;  %p1155_p0 = scmp.ge.s32.totalorder %s1641_s22, 1 }
  0x14   : > { %2021 = sst [smem:[#allocation24_spill]] %s1641_s22  ;;  %p67_p1 = scmp.eq.s32.totalorder %s1746_s23, 0 }
  0x15   : > { %p325_p2 = scmp.lt.s32.totalorder %s1641_s22, 3  ;;  %s2022_s3 = sld [smem:[#allocation31_spill]] }
  0x16   : > { %s1643_s28 = smov [#allocation10]   ;;  %p1160_p6 = scmp.ge.s32.totalorder %s1641_s22, 2 }
  0x17   : > { %p1754_p3 = pnand %p1155_p0, %p325_p2  ;;  %s338_s29 = sshll.u32 %s1643_s28, 4  ;;  %s339_s29 = int_to_ptr.vmem [resolvable:$true] %s338_s29 }
  0x18   : > { %s2025_s7 = sld [smem:[#allocation33_spill]]  ;;  %s1999_s15 = smov 128  }
  0x19   : > { %p1220_p4 = pneg %p1754_p3  ;;  %s2001_s16 = smov 8  }
  0x1a   : > { %s1646_s24 = smov [#allocation13]   ;;  %s1154_s28 = sadd.s32 4294967294, %s1641_s22  }
  0x1b   : > { %s336_s26 = sshll.u32 %s2022_s3, 4  ;;  %p1762_p5 = pnand %p1220_p4, %p67_p1  ;;  %s337_s26 = int_to_ptr.hbm [resolvable:$true] %s336_s26 }
  0x1c   : > { %s372_s25 = sshll.u32 %s1646_s24, 4  ;;  %s44_s12 = sadd.s32 1, %s1637_s21  ;;  %s373_s25 = int_to_ptr.vmem [resolvable:$true] %s372_s25 }
  0x1d   : > { %1223 = dma.hbm_to_vmem [thread:$0]  (!%p1762_p5), %s337_s26, 512, %s339_s29, [#allocation11], %s1999_s15, %s1999_s15, %s2001_s16  }
  0x1e   : > { %s370_s14 = sshll.u32 %s2025_s7, 4  ;;  %p46_p7 = scmp.ge.s32.totalorder %s44_s12, 2  ;;  %s371_s14 = int_to_ptr.hbm [resolvable:$true] %s370_s14 }
  0x1f   : > { %1229 = dma.hbm_to_vmem [thread:$0]  (!%p1762_p5), %s371_s14, 512, %s373_s25, [#allocation14], %s1999_s15, %s1999_s15, %s2001_s16  }
  0x20   : > { %s53_s13 = sadd.s32 1, %s1629_s19  ;;  %p60_p8 = scmp.ne.s32.totalorder %s1629_s19, %s1625_s18 }
  0x21   : > { %p61_p9 = scmp.eq.s32.totalorder %s1641_s22, 0  ;;  %s2055_s12 = smov (%p46_p7, %s44_s12), 0 }
  0x22   : > { %2026 = sst [smem:[#allocation25_spill]] %s2055_s12  ;;  %p66_p11 = scmp.ne.s32.totalorder %s1625_s18, %s1621_s17 }
  0x23   : > { %p1788_p10 = por %p61_p9, %p60_p8  ;;  %s48_s29 = ssub.s32 %s1637_s21, %s2055_s12 }
  0x24   : > { %p312_p12 = scmp.eq.s32.totalorder %s1746_s23, 1  ;;  %p51_p13 = scmp.eq.s32.totalorder %s48_s29, 0 }
  0x25   : > { %p1799_p0 = por %p67_p1, %p66_p11  ;;  %p318_p4 = scmp.eq.s32.totalorder %s1154_s28, 1 }
  0x26   : > { %p1803_p2 = por %p312_p12, %p60_p8  ;;  %p1251_p9 = scmp.lt.s32.totalorder %s1641_s22, 2 }
  0x27   : > { %s1808_s25 = scalar_select %p51_p13, %s1629_s19, %s53_s13  }
  0x28   : > { %s2029_s24 = scalar_select %p1803_p2, 1, 0 }
  0x29   : > { %2031 = sst [smem:[#allocation27_spill]] %s1808_s25  ;;  %p1810_p7 = por %p318_p4, %p66_p11 }
  0x2a   : > { %2030 = sst [smem:[#allocation26_spill]] %s2029_s24  ;;  %s2007_s16 = sand.u32 1, %s1629_s19  }
  0x2b   : > { %s2032_s15 = scalar_select %p1810_p7, 1, 0 }
  0x2c   : > { %s1817_s3 = sshll.u32 %s1637_s21, 3  ;;  %s1821_s29 = sshll.u32 %s2007_s16, 3 }
  0x2d   : > { %2033 = sst [smem:[#allocation28_spill]] %s2032_s15  ;;  %p1825_p8 = pnand %p1251_p9, %p1788_p10 }
  0x2e   : > { %s426_s28 = sand.u32 1, %s1641_s22   ;;  %s2035_s1 = sld [smem:[#allocation30_spill]] }
  0x2f   : > { %s430_s15 = scalar_lea.vmem [#allocation7], %s1821_s29  ;;  %s2036_s5 = sld [smem:[#allocation32_spill]] }
  0x30   : > { %s438_s21 = sshll.u32 %s430_s15, 4  ;;  %s427_s24 = scalar_lea.sflag [#allocation8], %s426_s28  ;;  %s439_s21 = int_to_ptr.vmem [resolvable:$true] %s438_s21 }
  0x31   : > { %s1647_s22 = smov [#allocation12]   ;;  %s2037_s9 = sld [smem:[#allocation34_spill]] }
  0x32   : > { %s355_s12 = sshll.u32 %s1647_s22, 4  ;;  %s2039_s16 = smov 128   ;;  %s356_s12 = int_to_ptr.vmem [resolvable:$true] %s355_s12 }
  0x33   : > { %s1648_s28 = smov [#allocation15]   ;;  %s2040_s0 = sld [smem:[#allocation29_spill]] }
  0x34   : > { %s434_s25 = scalar_lea.hbm %s2035_s1, %s1817_s3  ;;  %s410_s13 = scalar_lea.vmem [#allocation4], %s1821_s29 }
  0x35   : > { %s436_s17 = sshll.u32 %s434_s25, 4  ;;  %s353_s10 = sshll.u32 %s2036_s5, 4  ;;  %s437_s17 = int_to_ptr.hbm [resolvable:$true] %s436_s17  ;;  %s354_s10 = int_to_ptr.hbm [resolvable:$true] %s353_s10 }
  0x36   : > { %1239 = dma.hbm_to_vmem [thread:$0]  (!%p1825_p8), %s437_s17, 128, %s439_s21, %s427_s24  }
  0x37   : > { %s387_s15 = sshll.u32 %s2037_s9, 4  ;;  %s2038_s25 = smov 8   ;;  %s388_s15 = int_to_ptr.hbm [resolvable:$true] %s387_s15 }
  0x38   : > { %1226 = dma.hbm_to_vmem [thread:$0]  (!%p1762_p5), %s354_s10, 512, %s356_s12, [#allocation11], %s2039_s16, %s2039_s16, %s2038_s25  }
  0x39   : > { %s389_s17 = sshll.u32 %s1648_s28, 4  ;;  %s415_s22 = scalar_lea.hbm %s2040_s0, %s1817_s3  ;;  %s390_s17 = int_to_ptr.vmem [resolvable:$true] %s389_s17 }
  0x3a   : > { %1232 = dma.hbm_to_vmem [thread:$0]  (!%p1762_p5), %s388_s15, 512, %s390_s17, [#allocation14], %s2039_s16, %s2039_s16, %s2038_s25  }
  0x3b   : > { %s417_s1 = sshll.u32 %s415_s22, 4  ;;  %s419_s5 = sshll.u32 %s410_s13, 4  ;;  %s418_s1 = int_to_ptr.hbm [resolvable:$true] %s417_s1  ;;  %s420_s5 = int_to_ptr.vmem [resolvable:$true] %s419_s5 }
  0x3c   : > { %s2041_s9 = sand.u32 1, %s1629_s19   ;;  %s453_s21 = scalar_lea.hbm %s1989_s2, %s1817_s3 }
  0x3d   : > { %s407_s10 = scalar_lea.sflag [#allocation5], %s2041_s9  ;;  %s455_s26 = sshll.u32 %s453_s21, 4  ;;  %s456_s26 = int_to_ptr.hbm [resolvable:$true] %s455_s26 }
  0x3e   : > { %1236 = dma.hbm_to_vmem [thread:$0]  (!%p1825_p8), %s418_s1, 128, %s420_s5, %s407_s10  }
  0x3f   : > { %s449_s0 = scalar_lea.vmem [#allocation9], %s1821_s29  ;;  %466 = sbr.rel (%p1754_p3) target bundleno = 1120 (0x460), region = 64 }
  0x40   : > { %s457_s30 = sshll.u32 %s449_s0, 4  ;;  %s1872_s15 = sand.u32 (!%p1754_p3), 1, %s1625_s18   ;;  %s458_s30 = int_to_ptr.vmem [resolvable:$true] %s457_s30 }
  0x41   : > { %1242 = dma.hbm_to_vmem [thread:$0]  (!%p1825_p8), %s456_s26, 128, %s458_s30, %s427_s24  }
  0x42   : > { %s1875_s5 = sshll.u32 (!%p1754_p3), %s1872_s15, 3  ;;  %s469_s3 = scalar_lea.sflag (!%p1754_p3), [#allocation5], %s1872_s15 }
  0x43   : > { %s472_s9 = scalar_lea.vmem (!%p1754_p3), [#allocation4], %s1875_s5 }
  0x44   : > { %1600 = dma.done.wait (%p1799_p0), %s469_s3, 128  }
  0x45   : > { %1602 = vsyncadd (%p1799_p0), %s469_s3, 4294967168  ;;  %s478_s0 = sand.u32 1, %s1746_s23   ;;  %s482_s27 = scalar_lea.vmem [#allocation7], %s1875_s5 }
  0x46   : > { %s479_s7 = scalar_lea.sflag [#allocation8], %s478_s0 }
  0x47   : > { %1604 = dma.done.wait (%p1799_p0), %s479_s7, 256  }
  0x48   : > { %1606 = vsyncadd (%p1799_p0), %s479_s7, 4294967040  ;;  %s492_s24 = scalar_lea.vmem [#allocation9], %s1875_s5 }
  0x49   : > { %1608 = dma.done.wait (%p67_p1), [#allocation11], 1024  }
  0x4a   : > { %1610 = vsyncadd (%p67_p1), [#allocation11], 4294966272 }
  0x4b   : > { %1612 = dma.done.wait (%p67_p1), [#allocation14], 1024  }
  0x4c   : > { %1614 = vsyncadd (%p67_p1), [#allocation14], 4294966272  ;;  %v570_v0 = vld [vmem:[#allocation12 + $0x18] sm:$0xff]  ;;  %v569_v1 = vld [vmem:[#allocation12 + $0x10] sm:$0xff]  ;;  %vm575_vm0 = vcmask 261120   ;;  %vm669_vm1 = vcmask 64512  }
  0x4d   : > { %v637_v2 = vld [vmem:[#allocation10 + $0x18] sm:$0xff]  ;;  %591 = vmatpush.msra.mxu0 %v570_v0  ;;  %v636_v3 = vld [vmem:[#allocation10 + $0x10] sm:$0xff]  ;;  %v568_v4 = vld [vmem:[#allocation12 + $0x8] sm:$0xff]  ;;  %s1649_s16 = smov 104   ;;  %s1650_s17 = smov 120   ;;  %vm939_vm2 = vcmask 130048  }
  0x4e   : > { %658 = vmatpush.msra.mxu2 %v637_v2  ;;  %v635_v5 = vld [vmem:[#allocation10 + $0x8] sm:$0xff]  ;;  %v567_v6 = vld [vmem:[#allocation12] sm:$0xff]  ;;  %v633_v9 = vld [vmem:[%s472_s9] sm:$0xff]  ;;  %s1651_s22 = smov 112   ;;  %s1652_s10 = smov 16   ;;  %vm941_vm3 = vcmask 195584  }
  0x4f   : > { %592 = vmatpush.msra.mxu0 %v569_v1  ;;  %v634_v7 = vld [vmem:[#allocation10] sm:$0xff]  ;;  %v604_v18 = vld [vmem:[#allocation13 + $0x18] sm:$0xff]  ;;  %v603_v19 = vld [vmem:[#allocation13 + $0x10] sm:$0xff]  ;;  %s1653_s12 = smov 8   ;;  %s1654_s28 = smov 24  }
  0x50   : > { %659 = vmatpush.msra.mxu2 %v636_v3  ;;  %v566_v8 = vld [vmem:[%s482_s27] sm:$0xff]  ;;  %624 = vmatpush.msra.mxu1 %v604_v18  ;;  %v600_v30 = vld [vmem:[%s492_s24] sm:$0xff]  ;;  %s1193_s21 = sshll.u32 %s1633_s20, 3  ;;  %s2043_s27 = sld [smem:[#allocation35_spill]] }
  0x51   : > { %593 = vmatpush.msra.mxu0 %v568_v4  ;;  %v1317_v10 = vld [vmem:[%s1993_s6] ss:$0 sm:$0xff]  ;;  %v602_v28 = vld [vmem:[#allocation13 + $0x8] sm:$0xff]  ;;  %s987_s9 = scalar_lea.hbm %s1998_s11, %s1193_s21  ;;  %s561_s24 = scalar_lea.vmem [#allocation16], %s1875_s5 }
  0x52   : > { %660 = vmatpush.msra.mxu2 %v635_v5  ;;  %v1318_v13 = vld [vmem:[%s1991_s4] ss:$0 sm:$0xff]  ;;  %625 = vmatpush.msra.mxu1 %v603_v19  ;;  %v944_v18 = vld [vmem:[#allocation15 + $0x8] sm:$0xff]  ;;  %s989_s23 = sshll.u32 %s561_s24, 4  ;;  %s991_s14 = sshll.u32 %s987_s9, 4  ;;  %s990_s23 = int_to_ptr.vmem [resolvable:$true] %s989_s23  ;;  %s992_s14 = int_to_ptr.hbm [resolvable:$true] %s991_s14 }
  0x53   : > { %594 = vmatpush.msra.mxu0 %v567_v6  ;;  %v601_v29 = vld [vmem:[#allocation13] sm:$0xff]  ;;  %s976_s29 = scalar_lea.sflag [#allocation6], %s1872_s15  ;;  %s1561_s25 = sshra.s32 %s992_s14, 4  ;;  %s1562_s25 = int_to_ptr.hbm [resolvable:$true] %s1561_s25 }
  0x54   : > { %661 = vmatpush.msra.mxu2 %v634_v7  ;;  %1176 = vmatmul.msk.f32.vlgmr.msra.gmra.mxu0 %vm575_vm0, %v566_v8  ;;  %v1319_v42 = vld [vmem:[%s1995_s8] ss:$0 sm:$0xff]  ;;  %s1563_s20 = scalar_lea.hbm %s1562_s25, 8  ;;  %p1568_p10 = scmp.lt.s32.totalorder %s1562_s25, %s1998_s11 }
  0x55   : > { %1178 = vmatmul.msk.f32.vlgmr.msra.gmra.mxu2 %vm575_vm0, %v633_v9  ;;  %626 = vmatpush.msra.mxu1 %v602_v28  ;;  %v943_v19 = vld [vmem:[#allocation15] sm:$0xff]  ;;  %p1564_p1 = scmp.ne.s32.totalorder %s1562_s25, %s1563_s20 }
  0x57   : > { %627 = vmatpush.msra.mxu1 %v601_v29  ;;  %p1565_p3 = pnand %p1564_p1, %p1803_p2 }
  0x58   : > { %1177 = vmatmul.msk.f32.vlgmr.msra.gmra.mxu1 %vm575_vm0, %v600_v30 }
  0x59   : > { %p1566_p5 = pneg %p1565_p3 }
  0xd1   : > { %v596_v11 = vpop.f32.mrf.mxu0 }
  0xd2   : > { %v597_v12 = vadd.f32 %v1317_v10, %v596_v11 }
  0xd4   : > { %599 = vst.msk [vmem:[#allocation2] sm:$0xff] %vm575_vm0, %v597_v12 }
  0xd5   : > { %v629_v43 = vpop.f32.mrf.mxu1 }
  0xd6   : > { %v630_v44 = vadd.f32 %v1319_v42, %v629_v43 }
  0xd8   : > { %v663_v14 = vpop.f32.mrf.mxu2  ;;  %632 = vst.msk [vmem:[#allocation3] sm:$0xff] %vm575_vm0, %v630_v44 }
  0xd9   : > { %v664_v15 = vadd.f32 %v1318_v13, %v663_v14 }
  0xdb   : > { %v667_v16 = vld [vmem:[#allocation2] sm:$0xff]  ;;  %v666_v17 = vmul.f32 0.35355338, %v664_v15 }
  0xdc   : > { %863 = vrot.lane.b32.xlu2 %v667_v16, %s1649_s16  ;;  %732 = vrot.lane.b32.xlu1 %v667_v16, %s1650_s17 }
  0xdd   : > { %798 = vrot.lane.b32.xlu0 %v667_v16, %s1651_s22  ;;  %1179 = vmatpush.xpose.msk.msra.mxu3 %vm669_vm1, %v667_v16  ;;  %v946_v16 = vld [vmem:[#allocation15 + $0x18] sm:$0xff] }
  0xdf   : > { %v668_v45 = vld [vmem:[#allocation3] sm:$0xff] }
  0xe0   : > { %1180 = vmatmul.msk.f32.vlgmr.msra.gmra.mxu3 %vm669_vm1, %v666_v17 }
  0xe1   : > { %725 = vmatpush.msrb.mxu3 %v668_v45 }
  0xe4   : > { %861 = vrot.lane.b32.xlu2 %v666_v17, %s1649_s16  ;;  %730 = vrot.lane.b32.xlu1 %v666_v17, %s1650_s17 }
  0xe5   : > { %796 = vrot.lane.b32.xlu0 %v666_v17, %s1651_s22  ;;  %v945_v17 = vld [vmem:[#allocation15 + $0x10] sm:$0xff] }
 0x136   : > { %v864_v21 = vpop.permute.xlu2 %863 }
 0x13e   : > { %v862_v25 = vpop.permute.xlu2 %861 }
 0x14e   : > { %v733_v20 = vpop.permute.xlu1 %732 }
 0x14f   : > { %v799_v22 = vpop.permute.xlu0 %798  ;;  %1182 = vmatpush.xpose.msk.msrb.mxu0 %vm669_vm1, %v733_v20 }
 0x150   : > { %1185 = vmatpush.xpose.msk.msrb.mxu2 %vm669_vm1, %v799_v22 }
 0x153   : > { %1188 = vmatpush.xpose.msk.msra.mxu0 %vm669_vm1, %v864_v21 }
 0x154   : > { %966 = vmatpush.msra.mxu2 %v946_v16 }
 0x156   : > { %v731_v23 = vpop.permute.xlu1 %730  ;;  %967 = vmatpush.msra.mxu2 %v945_v17 }
 0x157   : > { %v797_v24 = vpop.permute.xlu0 %796  ;;  %1183 = vmatmul.msk.f32.vlgmr.msrb.gmra.mxu0 %vm669_vm1, %v731_v23 }
 0x158   : > { %1186 = vmatmul.msk.f32.vlgmr.msrb.gmra.mxu2 %vm669_vm1, %v797_v24 }
 0x159   : > { %968 = vmatpush.msra.mxu2 %v944_v18 }
 0x15b   : > { %969 = vmatpush.msra.mxu2 %v943_v19 }
 0x15f   : > { %1189 = vmatmul.msk.f32.vlgmr.msra.gmra.mxu0 %vm669_vm1, %v862_v25 }
 0x163   : > { %v693_v26 = vpop.f32.mrf.mxu3 }
 0x164   : > { %v696_v27 = vsel %vm669_vm1, %v693_v26, -inf }
 0x165   : > { %697 = vmax.xlane.f32.xlu0 %v696_v27 }
 0x1d4   : > { %v755_v31 = vpop.f32.mrf.mxu0 }
 0x1d5   : > { %v758_v32 = vsel %vm669_vm1, %v755_v31, -inf }
 0x1d6   : > { %759 = vmax.xlane.f32.xlu1 %v758_v32 }
 0x1d8   : > { %v698_v33 = vpop.xlane.xlu0 %697 }
 0x1d9   : > { %v699_v34 = vsub.f32 %v693_v26, %v698_v33  ;;  %v1320_v26 = vld [vmem:[%s2043_s27] ss:$0 sm:$0xff] }
 0x1db   : > { %v700_v35 = vmul.f32 1.442695, %v699_v34  ;;  %v821_v36 = vpop.f32.mrf.mxu2 }
 0x1dc   : > { %v824_v37 = vsel %vm669_vm1, %v821_v36, -inf  ;;  %v886_v38 = vpop.f32.mrf.mxu0 }
 0x1dd   : > { %1321 = vpow2.f32 %v700_v35  ;;  %825 = vmax.xlane.f32.xlu2 %v824_v37  ;;  %v889_v40 = vsel %vm669_vm1, %v886_v38, -inf }
 0x1e3   : > { %v1322_v39 = vpop.eup %1321 }
 0x1e4   : > { %v702_v41 = vsel %vm669_vm1, %v1322_v39, 0.0 }
 0x1e5   : > { %890 = vmax.xlane.f32.xlu2 %v889_v40  ;;  %703 = vadd.xlane.f32.xlu0 %v702_v41 }
 0x249   : > { %v760_v46 = vpop.xlane.xlu1 %759 }
 0x24a   : > { %v761_v47 = vsub.f32 %v755_v31, %v760_v46 }
 0x24c   : > { %v762_v48 = vmul.f32 1.442695, %v761_v47 }
 0x24e   : > { %1323 = vpow2.f32 %v762_v48 }
 0x250   : > { %v826_v49 = vpop.xlane.xlu2 %825 }
 0x251   : > { %v827_v50 = vsub.f32 %v821_v36, %v826_v49 }
 0x253   : > { %v828_v51 = vmul.f32 1.442695, %v827_v50 }
 0x254   : > { %v1324_v52 = vpop.eup %1323 }
 0x255   : > { %1325 = vpow2.f32 %v828_v51  ;;  %v764_v53 = vsel %vm669_vm1, %v1324_v52, 0.0 }
 0x256   : > { %765 = vadd.xlane.f32.xlu1 %v764_v53 }
 0x258   : > { %v891_v54 = vpop.xlane.xlu2 %890  ;;  %v704_v55 = vpop.xlane.xlu0 %703 }
 0x259   : > { %v892_v56 = vsub.f32 %v886_v38, %v891_v54  ;;  %1327 = vrcp.f32 %v704_v55 }
 0x25b   : > { %v1326_v57 = vpop.eup %1325  ;;  %v893_v58 = vmul.f32 1.442695, %v892_v56 }
 0x25c   : > { %v830_v59 = vsel %vm669_vm1, %v1326_v57, 0.0 }
 0x25d   : > { %1329 = vpow2.f32 %v893_v58  ;;  %831 = vadd.xlane.f32.xlu2 %v830_v59 }
 0x25f   : > { %v1328_v60 = vpop.eup %1327 }
 0x260   : > { %v706_v61 = vmul.f32 %v1328_v60, %v1322_v39 }
 0x262   : > { %1181 = vmatmul.msk.f32.vlgmr.msrb.gmra.mxu3 %vm669_vm1, %v706_v61 }
 0x263   : > { %v1330_v62 = vpop.eup %1329 }
 0x264   : > { %v895_v63 = vsel %vm669_vm1, %v1330_v62, 0.0 }
 0x265   : > { %896 = vadd.xlane.f32.xlu0 %v895_v63 }
 0x26f   : > { %770 = vrot.lane.b32.xlu1 %v668_v45, %s1650_s17 }
 0x275   : > { %835 = vrot.lane.b32.xlu2 %v668_v45, %s1651_s22  ;;  %s1567_s22 = scalar_lea.hbm %s1998_s11, 16 }
 0x276   : > { %p1569_p11 = scmp.lt.s32.totalorder %s1567_s22, %s1563_s20 }
 0x278   : > { %p1570_p12 = por %p1569_p11, %p1568_p10 }
 0x279   : > { %900 = vrot.lane.b32.xlu0 %v668_v45, %s1649_s16 }
 0x27a   : > { %p1571_p13 = pnand %p1570_p12, %p1566_p5 }
 0x2c9   : > { %v766_v1 = vpop.xlane.xlu1 %765 }
 0x2d0   : > { %v832_v0 = vpop.xlane.xlu2 %831 }
 0x2d1   : > { %1331 = vrcp.f32 %v832_v0 }
 0x2d2   : > { %1333 = vrcp.f32 %v766_v1 }
 0x2d7   : > { %v1332_v2 = vpop.eup %1331 }
 0x2d8   : > { %v834_v3 = vmul.f32 %v1332_v2, %v1326_v57  ;;  %v836_v4 = vpop.permute.xlu2 %835  ;;  %v1334_v5 = vpop.eup %1333 }
 0x2d9   : > { %856 = vmatpush.msra.mxu3 %v836_v4  ;;  %v897_v6 = vpop.xlane.xlu0 %896  ;;  %v768_v8 = vmul.f32 %v1334_v5, %v1324_v52 }
 0x2da   : > { %1187 = vmatmul.msk.f32.vlgmr.msra.gmra.mxu3 %vm669_vm1, %v834_v3  ;;  %1335 = vrcp.f32 %v897_v6 }
 0x2e0   : > { %v1336_v9 = vpop.eup %1335 }
 0x2e1   : > { %v771_v7 = vpop.permute.xlu1 %770  ;;  %v899_v10 = vmul.f32 %v1336_v9, %v1330_v62 }
 0x2e2   : > { %791 = vmatpush.msrb.mxu1 %v771_v7 }
 0x2e3   : > { %1184 = vmatmul.msk.f32.vlgmr.msrb.gmra.mxu1 %vm669_vm1, %v768_v8 }
 0x2e5   : > { %v727_v12 = vpop.f32.mrf.mxu3 }
 0x2eb   : > { %v901_v11 = vpop.permute.xlu0 %900 }
 0x2ec   : > { %921 = vmatpush.msra.mxu1 %v901_v11 }
 0x2ed   : > { %1190 = vmatmul.msk.f32.vlgmr.msra.gmra.mxu1 %vm669_vm1, %v899_v10 }
 0x35d   : > { %v858_v13 = vpop.f32.mrf.mxu3 }
 0x35e   : > { %931 = vrot.lane.b32.xlu0 %v858_v13, %s1652_s10 }
 0x360   : > { %v793_v14 = vpop.f32.mrf.mxu1 }
 0x361   : > { %927 = vrot.lane.b32.xlu1 %v793_v14, %s1653_s12 }
 0x36a   : > { %v923_v15 = vpop.f32.mrf.mxu1 }
 0x36b   : > { %935 = vrot.lane.b32.xlu2 %v923_v15, %s1654_s28 }
 0x3c5   : > { %v936_v23 = vpop.permute.xlu2 %935 }
 0x3d0   : > { %v932_v21 = vpop.permute.xlu0 %931 }
 0x3d3   : > { %v928_v20 = vpop.permute.xlu1 %927 }
 0x3d4   : > { %v938_v22 = vsel %vm669_vm1, %v727_v12, %v928_v20 }
 0x3d5   : > { %v940_v24 = vsel %vm939_vm2, %v938_v22, %v932_v21 }
 0x3d6   : > { %v942_v25 = vsel %vm941_vm3, %v940_v24, %v936_v23 }
 0x3d7   : > { %1191 = vmatmul.msk.f32.vlgmr.msra.gmra.mxu2 %vm575_vm0, %v942_v25 }
 0x45a   : > { %v971_v27 = vpop.f32.mrf.mxu2 }
 0x45b   : > { %v972_v28 = vadd.f32 %v1320_v26, %v971_v27 }
 0x45d   : > { %974 = vst [vmem:[%s561_s24] sm:$0xff] %v972_v28 }
 0x45e   : > { %1574 = shalt.err (!%p1571_p13)
}
 0x45f   : > { %1218 = dma.vmem_to_hbm [thread:$0]  (%p1803_p2), %s990_s23, 128, %s992_s14, %s976_s29  }
 0x460 PF: > { %s2044_s15 = sld [smem:[#allocation22_spill]]  ;;  %p1244_p0 = pnand %p1160_p6, %p1810_p7 }
 0x461   : > { %s2046_s10 = sld [smem:[#allocation24_spill]] }
 0x462   : > { %p1245_p4 = pneg %p1244_p0 }
 0x466   : > { %s1003_s12 = sand.u32 1, %s2044_s15  }
 0x467   : > { %s1004_s28 = scalar_lea.sflag [#allocation6], %s1003_s12 }
 0x468   : > { %1616 = dma.done.wait (%p1245_p4), %s1004_s28, 128  }
 0x469   : > { %1618 = vsyncadd (%p1245_p4), %s1004_s28, 4294967168  ;;  %s32_s22 = sadd.s32 1, %s2046_s10   ;;  %s2047_s21 = sld [smem:[#allocation27_spill]] }
 0x46a   : > { %p29_p9 = scmp.ge.s32.totalorder %s32_s22, 4   ;;  %s2048_s20 = sld [smem:[#allocation23_spill]] }
 0x46b   : > { %s2049_s26 = sld [smem:[#allocation25_spill]]  ;;  %s2050_s17 = smov %s1625_s18 }
 0x46c   : > { %s2051_s18 = smov %s1629_s19 }
 0x46d   :  { %31 = sbr.rel (!%p29_p9) target bundleno = 18 (0x12), region = 153 }
 0x46f   : > { %s2052_s19 = smov %s2047_s21 }
 0x471   : > { %s2053_s21 = smov %s2049_s26 }
 0x472   :  { %1010 = vsyncpa [#allocation5], 1 }
 0x473   :  { %1012 = vsyncpa [#allocation5 + $0x1], 1 }
 0x474   :  { %1013 = vsyncpa [#allocation8], 1 }
 0x475   :  { %1015 = vsyncpa [#allocation8 + $0x1], 1 }
 0x476   :  { %1016 = vsyncpa [#allocation11], 1 }
 0x477   :  { %1017 = vsyncpa [#allocation14], 1 }
 0x478   :  { %1018 = vsyncpa [#allocation6], 1 }
 0x479   :  { %1020 = vsyncpa [#allocation6 + $0x1], 1 }

</bundles_post_ra>
